<compile_context>
chip_gen: v6e
topology: v6e:2x2x1
jax: 0.10.0
libtpu: 0.0.40
codegen_flags: <defaults>
</compile_context>

<pallas_src>
import functools

import jax
import jax.numpy as jnp
from jax.experimental import pallas as pl
from jax.experimental.pallas import tpu as pltpu

# ---------------------------------------------------------------------------
# f-GAN activation / conjugate tables (Nowozin et al. 2016) -- used by the
# plain-JAX reference, which mirrors the PyTorch forward exactly.
# ---------------------------------------------------------------------------
ACTIVATIONS = {
    "KLD": lambda v: v,
    "RKL": lambda v: -jnp.exp(-v),
    "CHI": lambda v: v,
    "SQH": lambda v: 1.0 - jnp.exp(-v),
    "JSD": lambda v: jnp.log(2.0) - jnp.log1p(jnp.exp(-v)),
    "GAN": lambda v: -jnp.log1p(jnp.exp(-v)),
}

CONJUGATES = {
    "KLD": lambda t: jnp.exp(t - 1.0),
    "RKL": lambda t: -1.0 - jnp.log(-t),
    "CHI": lambda t: 0.25 * t * t + t,
    "SQH": lambda t: t / (1.0 - t),
    "JSD": lambda t: -jnp.log(2.0 - jnp.exp(t)),
    "GAN": lambda t: -jnp.log(1.0 - jnp.exp(t)),
}


def _softplus(v):
    # Numerically stable softplus: one exp + one log1p per element (EUP).
    return jnp.maximum(v, 0.0) + jnp.log1p(jnp.exp(-jnp.abs(v)))


# Fused  neg_conj(v) = -f*( g_f(v) )  per divergence (algebraically identical
# to composing the two tables above, but cheaper and numerically stable).
FUSED_NEG_CONJ = {
    "KLD": lambda v: -jnp.exp(v - 1.0),
    "RKL": lambda v: 1.0 - v,
    "CHI": lambda v: -(0.25 * v * v + v),
    "SQH": lambda v: 1.0 - jnp.exp(v),
    "JSD": lambda v: jnp.log(2.0) - _softplus(v),
    "GAN": lambda v: -_softplus(v),
}

LANES = 128
SUBLANES = 8
MAX_BLOCK_ROWS_1TC = 8192    # 8192 x 128 f32 = 4 MiB/block (8 MiB double-buffered)
MAX_BLOCK_ROWS_2TC = 16384   # 8 MiB/block per core on v7x (16 MiB double-buffered)


def _tensorcores_per_chip() -> int:
    """Best-effort TensorCores-per-chip count (2 on v7x, 1 on v5e/v6e)."""
    try:
        info = pltpu.get_tpu_info()
        for attr in ("num_cores", "core_count", "num_tensorcores",
                     "tensorcore_count", "cores_per_chip", "num_tensor_cores"):
            n = getattr(info, attr, None)
            if isinstance(n, int) and 1 <= n <= 16:
                return int(n)
    except Exception:
        pass
    try:
        kind = jax.devices()[0].device_kind.lower()
        if "7" in kind:   # v7x family: 2 TensorCores per chip
            return 2
    except Exception:
        pass
    return 1


def _q_loss_kernel(v_ref, out_ref, *, divergence, block_rows, blocks_per_split,
                   first_masked_block, mask_needed, full_rows, rem_lanes):
    """Fused elementwise -f*(g(v)); per-core partial sum lives in the resident
    (1, 8, 128) f32 output block; only the last block(s) pay the padding mask."""
    c = pl.program_id(0)   # parallel axis (TensorCore split on v7x)
    s = pl.program_id(1)   # carried reduction axis

    @pl.when(s == 0)
    def _():
        out_ref[...] = jnp.zeros((1, SUBLANES, LANES), jnp.float32)

    v = v_ref[...].astype(jnp.float32)
    neg_conj = FUSED_NEG_CONJ[divergence](v)

    def fold(x):
        # Fold sublane groups with pure VALU adds into one (8, 128) vreg.
        return x.reshape(block_rows // SUBLANES, SUBLANES, LANES).sum(axis=0)

    if mask_needed:
        b = c * blocks_per_split + s          # linear block index
        is_clean = b < first_masked_block

        @pl.when(is_clean)
        def _():
            out_ref[...] += fold(neg_conj)[None]

        @pl.when(b >= first_masked_block)
        def _():
            # Only blocks touching padding / out-of-bounds rows take this path.
            row_ids = jax.lax.broadcasted_iota(jnp.int32, (block_rows, LANES), 0)
            grow = b * block_rows + row_ids   # global row index (no elem-index overflow)
            valid = grow < full_rows
            if rem_lanes:
                lane_ids = jax.lax.broadcasted_iota(jnp.int32, (block_rows, LANES), 1)
                valid = valid | ((grow == full_rows) & (lane_ids < rem_lanes))
            # jnp.where is a select: garbage/Inf/NaN in padded rows is discarded.
            out_ref[...] += fold(jnp.where(valid, neg_conj, 0.0))[None]
    else:
        out_ref[...] += fold(neg_conj)[None]


def q_loss(v, chosen_divergence="KLD"):
    """Pallas implementation of Q_loss.forward(v) -> scalar (float32)."""
    total = int(v.size)
    if total == 0:
        return jnp.float32(float("nan"))   # matches torch.mean of an empty tensor

    flat = v.reshape(-1)

    rows = -(-total // LANES)                     # ceil(total / 128)
    rows_padded = ((rows + 15) // 16) * 16        # sublane-friendly for f32 AND bf16
    padded_total = rows_padded * LANES
    if padded_total != total:                     # pad < 2048 elements; no pad (and
        flat = jnp.pad(flat, (0, padded_total - total))  # no HBM copy) if already aligned
    v2d = flat.reshape(rows_padded, LANES)

    cores = _tensorcores_per_chip()
    max_block_rows = MAX_BLOCK_ROWS_2TC if cores >= 2 else MAX_BLOCK_ROWS_1TC
    block_rows = min(max_block_rows, rows_padded)
    n_blocks = -(-rows_padded // block_rows)

    num_splits = max(1, min(cores, n_blocks))     # leading "parallel" axis (v7x: 2)
    bpc = -(-n_blocks // num_splits)              # blocks per core

    elems_per_block = block_rows * LANES
    first_masked_block = total // elems_per_block
    mask_needed = first_masked_block < num_splits * bpc

    if num_splits * bpc > n_blocks:
        # Clamp duplicate trailing slots onto the last real block; their
        # contribution is fully masked out in the kernel.
        def in_index(c, s):
            return (jnp.minimum(c * bpc + s, n_blocks - 1), 0)
    else:
        def in_index(c, s):
            return (c * bpc + s, 0)

    kernel = functools.partial(
        _q_loss_kernel,
        divergence=chosen_divergence,
        block_rows=block_rows,
        blocks_per_split=bpc,
        first_masked_block=first_masked_block,
        mask_needed=mask_needed,
        full_rows=total // LANES,
        rem_lanes=total % LANES,
    )

    partials = pl.pallas_call(
        kernel,
        out_shape=jax.ShapeDtypeStruct((num_splits, SUBLANES, LANES), jnp.float32),
        grid_spec=pltpu.PrefetchScalarGridSpec(
            num_scalar_prefetch=0,
            grid=(num_splits, bpc),
            in_specs=[pl.BlockSpec((block_rows, LANES), in_index)],
            out_specs=pl.BlockSpec((1, SUBLANES, LANES), lambda c, s: (c, 0, 0)),
        ),
        compiler_params=pltpu.CompilerParams(
            dimension_semantics=("parallel", "arbitrary"),
        ),
    )(v2d)

    # Final tiny cross-lane/core reduce + mean normalization in the wrapper.
    return jnp.sum(partials) / jnp.float32(total)


def q_loss_ref(v, chosen_divergence="KLD"):
    """Plain-JAX reference mirroring the PyTorch forward exactly."""
    act = ACTIVATIONS[chosen_divergence](v.astype(jnp.float32))
    return jnp.mean(-CONJUGATES[chosen_divergence](act))


if __name__ == "__main__":
    key = jax.random.PRNGKey(0)
    # critic / discriminator output over a small batch of images: NCHW = (2, 4, 16, 16)
    v = jax.random.normal(key, (2, 4, 16, 16), dtype=jnp.float32)

    for div in ("KLD", "RKL", "CHI", "SQH", "JSD", "GAN"):
        got = jax.block_until_ready(q_loss(v, div))
        want = jax.block_until_ready(q_loss_ref(v, div))
        assert jnp.allclose(got, want, rtol=1e-4, atol=1e-4), (div, got, want)

    # Exercise the ragged / masked path with a non-lane-aligned size.
    v_odd = jax.random.normal(jax.random.PRNGKey(1), (2, 3, 7, 5), dtype=jnp.float32)
    for div in ("KLD", "GAN"):
        got = jax.block_until_ready(q_loss(v_odd, div))
        want = jax.block_until_ready(q_loss_ref(v_odd, div))
        assert jnp.allclose(got, want, rtol=1e-4, atol=1e-4), (div, got, want)

    # bf16 input path (halves HBM bytes; upcast to f32 happens in-register).
    v_bf16 = v.astype(jnp.bfloat16)
    got = jax.block_until_ready(q_loss(v_bf16, "KLD"))
    want = jax.block_until_ready(q_loss_ref(v_bf16, "KLD"))
    assert jnp.allclose(got, want, rtol=2e-2, atol=2e-2), (got, want)

    print("KERNEL_OK")
</pallas_src>

<mosaic_0001>
module attributes {stable_mosaic.version = 11 : i64} {
  func.func @_q_loss_kernel(%arg0: i32, %arg1: i32, %arg2: memref<16x128xf32, #tpu.memory_space<vmem>>, %arg3: memref<1x8x128xf32, #tpu.memory_space<vmem>>) attributes {dimension_semantics = [#tpu.dimension_semantics<parallel>, #tpu.dimension_semantics<arbitrary>], iteration_bounds = array<i64: 1, 1>, scalar_prefetch = 0 : i64, scratch_operands = 0 : i64, tpu.core_type = #tpu.core_type<tc>, window_params = [{transform_indices = @transform_0, window_bounds = array<i64: 16, 128>}, {transform_indices = @transform_1, window_bounds = array<i64: 1, 8, 128>}]} {
    %c0_i32 = arith.constant 0 : i32
    %0 = arith.cmpi eq, %arg1, %c0_i32 : i32
    %1 = arith.extui %0 : i1 to i32
    %c0_i32_0 = arith.constant 0 : i32
    %2 = arith.cmpi ne, %1, %c0_i32_0 : i32
    scf.if %2 {
      %cst_10 = arith.constant 0.000000e+00 : f32
      %15 = vector.broadcast %cst_10 : f32 to vector<1x8x128xf32>
      %c0_11 = arith.constant 0 : index
      %c0_12 = arith.constant 0 : index
      %c0_13 = arith.constant 0 : index
      %16 = vector.load %arg3[%c0_11, %c0_12, %c0_13] : memref<1x8x128xf32, #tpu.memory_space<vmem>>, vector<1x8x128xf32>
      tpu.vector_store %arg3[%c0_11, %c0_12, %c0_13], %15 {strides = array<i32>} : memref<1x8x128xf32, #tpu.memory_space<vmem>>, vector<1x8x128xf32>,
    } else {
    }
    %c0 = arith.constant 0 : index
    %c0_1 = arith.constant 0 : index
    %3 = vector.load %arg2[%c0, %c0_1] : memref<16x128xf32, #tpu.memory_space<vmem>>, vector<16x128xf32>
    %cst = arith.constant 1.000000e+00 : f32
    %4 = vector.broadcast %cst : f32 to vector<16x128xf32>
    %5 = arith.subf %3, %4 : vector<16x128xf32>
    %6 = math.exp %5 : vector<16x128xf32>
    %cst_2 = arith.constant 0.000000e+00 : f32
    %7 = vector.broadcast %cst_2 : f32 to vector<16x128xf32>
    %8 = arith.subf %7, %6 : vector<16x128xf32>
    %c0_3 = arith.constant 0 : index
    %c0_4 = arith.constant 0 : index
    %c0_5 = arith.constant 0 : index
    %9 = vector.load %arg3[%c0_3, %c0_4, %c0_5] : memref<1x8x128xf32, #tpu.memory_space<vmem>>, vector<1x8x128xf32>
    %10 = vector.shape_cast %8 : vector<16x128xf32> to vector<2x8x128xf32>
    %cst_6 = arith.constant dense<0.000000e+00> : vector<8x128xf32>
    %11 = vector.multi_reduction <add>, %10, %cst_6 [0] : vector<2x8x128xf32> to vector<8x128xf32>
    %12 = vector.shape_cast %11 : vector<8x128xf32> to vector<1x8x128xf32>
    %13 = arith.addf %9, %12 : vector<1x8x128xf32>
    %c0_7 = arith.constant 0 : index
    %c0_8 = arith.constant 0 : index
    %c0_9 = arith.constant 0 : index
    %14 = vector.load %arg3[%c0_7, %c0_8, %c0_9] : memref<1x8x128xf32, #tpu.memory_space<vmem>>, vector<1x8x128xf32>
    tpu.vector_store %arg3[%c0_7, %c0_8, %c0_9], %13 {strides = array<i32>} : memref<1x8x128xf32, #tpu.memory_space<vmem>>, vector<1x8x128xf32>,
    return
  }
  func.func @transform_0(%arg0: i32, %arg1: i32) -> (i32, i32) {
    %c1_i32 = arith.constant 1 : i32
    %0 = arith.muli %arg0, %c1_i32 : i32
    %1 = arith.addi %0, %arg1 : i32
    %c0_i32 = arith.constant 0 : i32
    %c0_i32_0 = arith.constant 0 : i32
    return %1, %c0_i32 : i32, i32
  }
  func.func @transform_1(%arg0: i32, %arg1: i32) -> (i32, i32, i32) {
    %c0_i32 = arith.constant 0 : i32
    %c0_i32_0 = arith.constant 0 : i32
    %c0_i32_1 = arith.constant 0 : i32
    return %arg0, %c0_i32, %c0_i32_0 : i32, i32, i32
  }
}

</mosaic_0001>

<bundles_post_ra>
// kernel: tpu_custom_call.1
= control target key start
LH: loop header
LB: loop body
LE: loop exit
PB: predicated region body
PF: predicated region fallthrough
CT: control target
= control target key end

     0   :  { %6 = vsyncpa [#allocation3], 0  ;;  %s138_s0 = inlined_call_operand.hbm [shape: f32[16,128], index: 0, kind: input, shape index: {}]   ;;  %s139_s1 = inlined_call_operand.hbm [shape: f32[1,8,128], index: 1, kind: output, shape index: {}]  }
   0x1   :  { %7 = vsyncpa [#allocation4], 0  ;;  %s118_s6 = smov [#allocation2]  }
   0x2   :  { %s17_s7 = sshll.u32 %s118_s6, 4  ;;  %s18_s7 = int_to_ptr.vmem [resolvable:$true] %s17_s7 }
   0x3   :  { %s82_s8 = scalar_lea.vmem %s18_s7, 256  ;;  %p87_p1 = scmp.lt.s32.totalorder %s18_s7, %s18_s7 }
   0x4   :  { %p83_p0 = scmp.ne.s32.totalorder %s18_s7, %s82_s8  ;;  %p88_p2 = scmp.lt.s32.totalorder %s82_s8, %s82_s8 }
   0x6   :  { %p89_p3 = por %p88_p2, %p87_p1 }
   0x8   :  { %p90_p4 = pnand %p89_p3, %p83_p0 }
   0xa   :  { %93 = shalt.err (!%p90_p4)
}
   0xb   :  { %s119_s9 = smov 128   ;;  %s120_s10 = smov 8  }
   0xc   :  { %23 = dma.hbm_to_vmem [thread:$0]  %s138_s0, 256, %s18_s7, [#allocation3], %s119_s9, %s119_s9, %s120_s10  }
   0xd   :  { %114 = dma.done.wait [#allocation3], 256  }
   0xe   :  { %115 = vsyncadd [#allocation3], 4294967040  ;;  %v34_v0 = vld [vmem:[#allocation2] sm:$0xff]  ;;  %v35_v1 = vld [vmem:[#allocation2 + $0x8] sm:$0xff]  ;;  %s121_s13 = smov [#allocation5]  }
   0xf   :  { %v63_v2 = vadd.f32 -1.0, %v34_v0  ;;  %v64_v3 = vadd.f32 -1.0, %v35_v1  ;;  %s54_s14 = sshll.u32 %s121_s13, 4  ;;  %s55_s14 = int_to_ptr.vmem [resolvable:$true] %s54_s14 }
  0x10   :  { %s94_s0 = scalar_lea.vmem %s55_s14, 128  ;;  %p99_p6 = scmp.lt.s32.totalorder %s55_s14, %s55_s14 }
  0x11   :  { %v38_v4 = vmul.f32 1.442695, %v63_v2  ;;  %v40_v5 = vmul.f32 1.442695, %v64_v3  ;;  %p95_p5 = scmp.ne.s32.totalorder %s55_s14, %s94_s0  ;;  %p100_p7 = scmp.lt.s32.totalorder %s94_s0, %s94_s0 }
  0x13   :  { %70 = vpow2.f32 %v38_v4  ;;  %p101_p8 = por %p100_p7, %p99_p6 }
  0x14   :  { %72 = vpow2.f32 %v40_v5 }
  0x15   :  { %p102_p9 = pnand %p101_p8, %p95_p5 }
  0x20   :  { %v71_v6 = vpop.eup %70 }
  0x21   :  { %v73_v7 = vpop.eup %72  ;;  %v42_v8 = vsub.f32 0.0, %v71_v6 }
  0x22   :  { %v43_v9 = vsub.f32 0.0, %v73_v7 }
  0x24   :  { %v45_v10 = vadd.f32 %v43_v9, %v42_v8 }
  0x26   :  { %47 = vst [vmem:[#allocation5] sm:$0xff] %v45_v10 }
  0x27   :  { %105 = shalt.err (!%p102_p9)
}
  0x28   :  { %57 = dma.vmem_to_hbm [thread:$0]  %s55_s14, 128, %s139_s1, [#allocation4]  }
  0x29   :  { %116 = dma.done.wait [#allocation4], 128  }
  0x2a   :  { %117 = vsyncadd [#allocation4], 4294967168 }
  0x2b   :  { %61 = vsyncpa [#allocation3], 1 }
  0x2c   :  { %62 = vsyncpa [#allocation4], 1 }

</bundles_post_ra>
